<compile_context>
chip_gen: v5e
topology: v5e:2x2
jax: 0.10.0
libtpu: 0.0.40
codegen_flags: <defaults>
</compile_context>

<pallas_src>
import functools

import jax
import jax.numpy as jnp
from jax.experimental import pallas as pl
from jax.experimental.pallas import tpu as pltpu

EPS = 1e-5  # PyTorch BatchNorm2d default eps


def _posneg_pool_bn_kernel(
    pos_ref, neg_ref, gamma_ref, beta_ref,                 # inputs
    out_pos_ref, out_neg_ref,                              # outputs (resident over batch axis)
    sum_pos_ref, sq_pos_ref, sum_neg_ref, sq_neg_ref,      # (1,1,1,tc) f32 accumulators
    *, n_total,
):
    """grid = (channel blocks [parallel], batch blocks [arbitrary / BN reduction])."""
    ni = pl.program_id(1)
    n_steps = pl.num_programs(1)
    tn, H, W, tc = pos_ref.shape
    Ho, Wo = H // 2, W // 2

    @pl.when(ni == 0)
    def _init():
        sum_pos_ref[...] = jnp.zeros_like(sum_pos_ref)
        sq_pos_ref[...] = jnp.zeros_like(sq_pos_ref)
        sum_neg_ref[...] = jnp.zeros_like(sum_neg_ref)
        sq_neg_ref[...] = jnp.zeros_like(sq_neg_ref)

    n_off = pl.multiple_of(ni * tn, tn)

    def pool_and_accumulate(x_ref, out_ref, sum_ref, sq_ref):
        # 2x2 pool in the input dtype: W direction via two sublane-strided loads,
        # H direction via a free leading-dim reshape + max (no strided access).
        left = x_ref[:, :, pl.ds(0, Wo, 2), :]
        right = x_ref[:, :, pl.ds(1, Wo, 2), :]
        xw = jnp.maximum(left, right)                       # (tn, H, Wo, tc)
        xw = xw.reshape(tn, Ho, 2, Wo, tc)
        pooled = jnp.maximum(xw[:, :, 0], xw[:, :, 1])      # (tn, Ho, Wo, tc)

        # Pooled tile goes straight into the resident output block (no big scratch).
        out_ref[pl.ds(n_off, tn)] = pooled.astype(out_ref.dtype)

        # Per-channel sum / sum-of-squares in f32 (tiny accumulators, hidden under DMA).
        pf = pooled.astype(jnp.float32)
        sum_ref[...] += jnp.sum(pf, axis=(0, 1, 2), keepdims=True)
        sq_ref[...] += jnp.sum(pf * pf, axis=(0, 1, 2), keepdims=True)

    pool_and_accumulate(pos_ref, out_pos_ref, sum_pos_ref, sq_pos_ref)
    pool_and_accumulate(neg_ref, out_neg_ref, sum_neg_ref, sq_neg_ref)

    # Finalize once all batch tiles of this channel block have been pooled:
    # batch statistics (biased variance, eps=1e-5) + folded per-channel affine,
    # applied in place to the resident output blocks.
    @pl.when(ni == n_steps - 1)
    def _finalize():
        inv_n = 1.0 / float(n_total * Ho * Wo)              # constant multiply, not divide
        g = gamma_ref[...].astype(jnp.float32)              # (1, 1, 1, tc)
        b = beta_ref[...].astype(jnp.float32)

        def normalize(out_ref, sum_ref, sq_ref):
            mean = sum_ref[...] * inv_n
            var = jnp.maximum(sq_ref[...] * inv_n - mean * mean, 0.0)
            inv = jax.lax.rsqrt(var + EPS)
            scale = inv * g                                 # folded per-channel affine
            shift = b - mean * scale
            p = out_ref[...].astype(jnp.float32)            # (N, Ho, Wo, tc)
            out_ref[...] = (p * scale + shift).astype(out_ref.dtype)

        normalize(out_pos_ref, sum_pos_ref, sq_pos_ref)
        normalize(out_neg_ref, sum_neg_ref, sq_neg_ref)


def _tpu_vmem_capacity_bytes():
    try:
        cap = getattr(pltpu.get_tpu_info(), "vmem_capacity_bytes", None)
        if cap:
            return int(cap)
    except Exception:
        pass
    return 128 << 20  # v5e/v6e default


def _choose_c_tile(C, N, Ho, Wo, itemsize, usable_bytes, two_tc_likely):
    # Largest divisor of C that is <= 128 (lane-dense when C is a multiple of 128).
    c_tile = min(C, 128)
    while C % c_tile:
        c_tile -= 1
    if C > 128 and c_tile < 8:
        # Awkward C (e.g. prime > 128): use the full channel dim rather than a tiny block.
        c_tile = C
    # TODO(synk): for C < 128 the output last dim is not lane-dense (masked stores);
    # folding (Wo, C) into the lane dim with a segmented stat reduction would fix this.

    # Resident pooled outputs (2 streams x 2 pipeline buffers) must leave room for the
    # input tiles; shrink the channel block on small-VMEM parts / large N.
    def resident(c):
        return 2 * 2 * N * Ho * Wo * c * itemsize

    while c_tile % 2 == 0 and c_tile > 8 and resident(c_tile) > 0.55 * usable_bytes:
        c_tile //= 2
    # TODO(synk): if resident(c_tile) still exceeds the budget (huge N on a 64 MiB part),
    # a two-pass scheme (pool+stats -> HBM, then an affine-only pass) is required.

    # Megacore: give the 'parallel' channel axis >= 2 blocks on 2-TC parts.
    if two_tc_likely and C // c_tile == 1 and c_tile >= 128 and c_tile % 2 == 0:
        c_tile //= 2
    return c_tile


def _pick_n_tile(n, h, w, c_tile, itemsize, budget_bytes):
    """Largest divisor of n whose (pos+neg) single-buffer input block fits the budget."""
    per_sample = 2 * h * w * c_tile * itemsize
    t = int(max(1, min(n, budget_bytes // max(per_sample, 1))))
    while n % t:
        t -= 1
    return t


def posneg_maxpool2d_nhwc(x_pos, x_neg, gamma, beta, *, n_tile=None, c_tile=None):
    """Native NHWC entry point (no HBM layout transposes). Returns NHWC outputs."""
    assert x_pos.shape == x_neg.shape
    N, H, W, C = x_pos.shape
    assert H % 2 == 0 and W % 2 == 0
    Ho, Wo = H // 2, W // 2
    itemsize = jnp.dtype(x_pos.dtype).itemsize

    # Generation-aware VMEM budget (v7x: 64 MiB / 2 TCs; v5e/v6e: 128 MiB / 1 TC).
    phys_vmem = _tpu_vmem_capacity_bytes()
    small_vmem = phys_vmem <= (96 << 20)
    if small_vmem:
        usable = min(phys_vmem - (8 << 20), 56 << 20)
    else:
        usable = min(phys_vmem - (24 << 20), 104 << 20)

    if c_tile is None:
        c_tile = _choose_c_tile(C, N, Ho, Wo, itemsize, usable, two_tc_likely=small_vmem)
    assert C % c_tile == 0, "c_tile must divide C"

    resident_out = 2 * 2 * N * Ho * Wo * c_tile * itemsize   # 2 streams x 2 buffers
    if n_tile is None:
        # Big input tiles on 128 MiB parts (mem-bound: amortize ~0.35 us per-step
        # overhead), tighter on v7x; bounded by what is left after resident outputs.
        cap = (7 << 20) if small_vmem else (14 << 20)
        leftover = max((usable - resident_out - (4 << 20)) // 2, 1 << 20)
        n_tile = _pick_n_tile(N, H, W, c_tile, itemsize, min(cap, leftover))
    assert N % n_tile == 0, "n_tile must divide N"

    grid = (C // c_tile, N // n_tile)   # (parallel channel blocks, reduction-last batch)

    g = gamma.reshape(1, 1, 1, C).astype(jnp.float32)
    b = beta.reshape(1, 1, 1, C).astype(jnp.float32)

    kernel = functools.partial(_posneg_pool_bn_kernel, n_total=N)

    in_specs = (
        pl.BlockSpec((n_tile, H, W, c_tile), lambda ci, ni: (ni, 0, 0, ci)),
        pl.BlockSpec((n_tile, H, W, c_tile), lambda ci, ni: (ni, 0, 0, ci)),
        pl.BlockSpec((1, 1, 1, c_tile), lambda ci, ni: (0, 0, 0, ci)),
        pl.BlockSpec((1, 1, 1, c_tile), lambda ci, ni: (0, 0, 0, ci)),
    )
    out_specs = (
        pl.BlockSpec((N, Ho, Wo, c_tile), lambda ci, ni: (0, 0, 0, ci)),
        pl.BlockSpec((N, Ho, Wo, c_tile), lambda ci, ni: (0, 0, 0, ci)),
    )
    scratch_shapes = (
        pltpu.VMEM((1, 1, 1, c_tile), jnp.float32),   # sum_pos
        pltpu.VMEM((1, 1, 1, c_tile), jnp.float32),   # sumsq_pos
        pltpu.VMEM((1, 1, 1, c_tile), jnp.float32),   # sum_neg
        pltpu.VMEM((1, 1, 1, c_tile), jnp.float32),   # sumsq_neg
    )
    out_shape = (
        jax.ShapeDtypeStruct((N, Ho, Wo, C), x_pos.dtype),
        jax.ShapeDtypeStruct((N, Ho, Wo, C), x_neg.dtype),
    )

    # Footprint: double-buffered (pos+neg) input blocks + resident / double-buffered
    # pooled output blocks + tiny f32 accumulators + slack.  Never clamped below need
    # (tile selection above already guarantees need <= usable).
    vmem_need = (
        2 * 2 * n_tile * H * W * c_tile * itemsize
        + resident_out
        + 4 * 8 * 128 * 4
        + (4 << 20)
    )
    vmem_limit = int(min(max(vmem_need, 32 << 20), usable))

    return pl.pallas_call(
        kernel,
        out_shape=out_shape,
        grid_spec=pltpu.PrefetchScalarGridSpec(
            num_scalar_prefetch=0,
            grid=grid,
            in_specs=in_specs,
            out_specs=out_specs,
            scratch_shapes=scratch_shapes,
        ),
        compiler_params=pltpu.CompilerParams(
            dimension_semantics=("parallel", "arbitrary"),
            vmem_limit_bytes=vmem_limit,
        ),
    )(x_pos, x_neg, g, b)


def posneg_maxpool2d(xs, gamma, beta, **tile_kwargs):
    """PyTorch-layout (NCHW) parity shim around the native-NHWC fused kernel.

    NHWC callers should use `posneg_maxpool2d_nhwc` directly: the two HBM transposes
    here cost more than the fused kernel itself on a memory-bound op.  The shared
    BatchNorm2d is in training mode, so each element of the pair is normalized with
    its own batch statistics, matching the PyTorch forward.
    """
    # TODO(synk): BatchNorm2d running_mean/running_var buffer updates (mutated twice
    # per forward in training mode) are not modeled; forward outputs are exact.
    x_pos = jnp.transpose(xs[0], (0, 2, 3, 1))  # NCHW -> NHWC (parity shim only)
    x_neg = jnp.transpose(xs[1], (0, 2, 3, 1))
    o_pos, o_neg = posneg_maxpool2d_nhwc(x_pos, x_neg, gamma, beta, **tile_kwargs)
    return (jnp.transpose(o_pos, (0, 3, 1, 2)),
            jnp.transpose(o_neg, (0, 3, 1, 2)))


def _reference_single(x, gamma, beta):
    """Pure-JAX reference (NCHW) for correctness checking."""
    N, C, H, W = x.shape
    p = x.reshape(N, C, H // 2, 2, W // 2, 2).max(axis=(3, 5))
    mean = p.mean(axis=(0, 2, 3), keepdims=True)
    var = ((p - mean) ** 2).mean(axis=(0, 2, 3), keepdims=True)
    return (p - mean) / jnp.sqrt(var + EPS) * gamma.reshape(1, C, 1, 1) + beta.reshape(
        1, C, 1, 1
    )


if __name__ == "__main__":
    key = jax.random.PRNGKey(0)
    k0, k1, k2, k3 = jax.random.split(key, 4)

    N, C, H, W = 2, 4, 16, 16
    x_pos = jax.random.normal(k0, (N, C, H, W), dtype=jnp.float32)
    x_neg = jax.random.normal(k1, (N, C, H, W), dtype=jnp.float32)

    # Non-trivial affine params to exercise the folded scale/shift path.
    gamma = 1.0 + 0.1 * jax.random.normal(k2, (C,), dtype=jnp.float32)
    beta = 0.1 * jax.random.normal(k3, (C,), dtype=jnp.float32)

    # n_tile=1 -> grid (1, 2): exercises the multi-step stat accumulation (init at
    # ni==0, accumulate, pl.when finalize on the last batch step).
    out_pos, out_neg = posneg_maxpool2d((x_pos, x_neg), gamma, beta, n_tile=1)
    out_pos = jax.block_until_ready(out_pos)
    out_neg = jax.block_until_ready(out_neg)

    ref_pos = _reference_single(x_pos, gamma, beta)
    ref_neg = _reference_single(x_neg, gamma, beta)

    assert out_pos.shape == (N, C, H // 2, W // 2)
    assert out_neg.shape == (N, C, H // 2, W // 2)
    assert jnp.allclose(out_pos, ref_pos, atol=5e-5, rtol=1e-5)
    assert jnp.allclose(out_neg, ref_neg, atol=5e-5, rtol=1e-5)

    print("KERNEL_OK")
</pallas_src>

<mosaic_0001>
module attributes {stable_mosaic.version = 11 : i64} {
  func.func @_posneg_pool_bn_kernel(%arg0: i32, %arg1: i32, %arg2: memref<1x16x16x4xf32, #tpu.memory_space<vmem>>, %arg3: memref<1x16x16x4xf32, #tpu.memory_space<vmem>>, %arg4: memref<1x1x1x4xf32, #tpu.memory_space<vmem>>, %arg5: memref<1x1x1x4xf32, #tpu.memory_space<vmem>>, %arg6: memref<2x8x8x4xf32, #tpu.memory_space<vmem>>, %arg7: memref<2x8x8x4xf32, #tpu.memory_space<vmem>>, %arg8: memref<1x1x1x4xf32, #tpu.memory_space<vmem>>, %arg9: memref<1x1x1x4xf32, #tpu.memory_space<vmem>>, %arg10: memref<1x1x1x4xf32, #tpu.memory_space<vmem>>, %arg11: memref<1x1x1x4xf32, #tpu.memory_space<vmem>>) attributes {dimension_semantics = [#tpu.dimension_semantics<parallel>, #tpu.dimension_semantics<arbitrary>], iteration_bounds = array<i64: 1, 2>, scalar_prefetch = 0 : i64, scratch_operands = 4 : i64, tpu.core_type = #tpu.core_type<tc>, window_params = [{transform_indices = @transform_0, window_bounds = array<i64: 1, 16, 16, 4>}, {transform_indices = @transform_1, window_bounds = array<i64: 1, 16, 16, 4>}, {transform_indices = @transform_2, window_bounds = array<i64: 1, 1, 1, 4>}, {transform_indices = @transform_3, window_bounds = array<i64: 1, 1, 1, 4>}, {transform_indices = @transform_4, window_bounds = array<i64: 2, 8, 8, 4>}, {transform_indices = @transform_5, window_bounds = array<i64: 2, 8, 8, 4>}]} {
    %c0_i32 = arith.constant 0 : i32
    %0 = arith.cmpi eq, %arg1, %c0_i32 : i32
    %1 = arith.extui %0 : i1 to i32
    %c0_i32_0 = arith.constant 0 : i32
    %2 = arith.cmpi ne, %1, %c0_i32_0 : i32
    scf.if %2 {
      %cst_58 = arith.constant 0.000000e+00 : f32
      %52 = vector.broadcast %cst_58 : f32 to vector<1x1x1x4xf32>
      %c0_59 = arith.constant 0 : index
      %c0_60 = arith.constant 0 : index
      %c0_61 = arith.constant 0 : index
      %c0_62 = arith.constant 0 : index
      %53 = vector.load %arg8[%c0_59, %c0_60, %c0_61, %c0_62] : memref<1x1x1x4xf32, #tpu.memory_space<vmem>>, vector<1x1x1x4xf32>
      tpu.vector_store %arg8[%c0_59, %c0_60, %c0_61, %c0_62], %52 {strides = array<i32>} : memref<1x1x1x4xf32, #tpu.memory_space<vmem>>, vector<1x1x1x4xf32>,
      %cst_63 = arith.constant 0.000000e+00 : f32
      %54 = vector.broadcast %cst_63 : f32 to vector<1x1x1x4xf32>
      %c0_64 = arith.constant 0 : index
      %c0_65 = arith.constant 0 : index
      %c0_66 = arith.constant 0 : index
      %c0_67 = arith.constant 0 : index
      %55 = vector.load %arg9[%c0_64, %c0_65, %c0_66, %c0_67] : memref<1x1x1x4xf32, #tpu.memory_space<vmem>>, vector<1x1x1x4xf32>
      tpu.vector_store %arg9[%c0_64, %c0_65, %c0_66, %c0_67], %54 {strides = array<i32>} : memref<1x1x1x4xf32, #tpu.memory_space<vmem>>, vector<1x1x1x4xf32>,
      %cst_68 = arith.constant 0.000000e+00 : f32
      %56 = vector.broadcast %cst_68 : f32 to vector<1x1x1x4xf32>
      %c0_69 = arith.constant 0 : index
      %c0_70 = arith.constant 0 : index
      %c0_71 = arith.constant 0 : index
      %c0_72 = arith.constant 0 : index
      %57 = vector.load %arg10[%c0_69, %c0_70, %c0_71, %c0_72] : memref<1x1x1x4xf32, #tpu.memory_space<vmem>>, vector<1x1x1x4xf32>
      tpu.vector_store %arg10[%c0_69, %c0_70, %c0_71, %c0_72], %56 {strides = array<i32>} : memref<1x1x1x4xf32, #tpu.memory_space<vmem>>, vector<1x1x1x4xf32>,
      %cst_73 = arith.constant 0.000000e+00 : f32
      %58 = vector.broadcast %cst_73 : f32 to vector<1x1x1x4xf32>
      %c0_74 = arith.constant 0 : index
      %c0_75 = arith.constant 0 : index
      %c0_76 = arith.constant 0 : index
      %c0_77 = arith.constant 0 : index
      %59 = vector.load %arg11[%c0_74, %c0_75, %c0_76, %c0_77] : memref<1x1x1x4xf32, #tpu.memory_space<vmem>>, vector<1x1x1x4xf32>
      tpu.vector_store %arg11[%c0_74, %c0_75, %c0_76, %c0_77], %58 {strides = array<i32>} : memref<1x1x1x4xf32, #tpu.memory_space<vmem>>, vector<1x1x1x4xf32>,
    } else {
    }
    %c1_i32 = arith.constant 1 : i32
    %3 = arith.muli %arg1, %c1_i32 : i32
    %4 = tpu.assume_multiple %3, 1 : i32
    %c0 = arith.constant 0 : index
    %c0_1 = arith.constant 0 : index
    %c0_2 = arith.constant 0 : index
    %c0_3 = arith.constant 0 : index
    %5 = tpu.strided_load %arg2[%c0, %c0_1, %c0_2, %c0_3] {strides = array<i32: 1, 1, 2, 1>} : memref<1x16x16x4xf32, #tpu.memory_space<vmem>>, vector<1x16x8x4xf32>
    %c0_4 = arith.constant 0 : index
    %c0_5 = arith.constant 0 : index
    %c1 = arith.constant 1 : index
    %c0_6 = arith.constant 0 : index
    %6 = tpu.strided_load %arg2[%c0_4, %c0_5, %c1, %c0_6] {strides = array<i32: 1, 1, 2, 1>} : memref<1x16x16x4xf32, #tpu.memory_space<vmem>>, vector<1x16x8x4xf32>
    %7 = arith.maximumf %5, %6 : vector<1x16x8x4xf32>
    %8 = vector.shape_cast %7 : vector<1x16x8x4xf32> to vector<1x8x2x8x4xf32>
    %9 = vector.extract_strided_slice %8 {offsets = [0, 0, 0, 0, 0], sizes = [1, 8, 1, 8, 4], strides = [1, 1, 1, 1, 1]} : vector<1x8x2x8x4xf32> to vector<1x8x1x8x4xf32>
    %10 = vector.shape_cast %9 : vector<1x8x1x8x4xf32> to vector<1x8x8x4xf32>
    %11 = vector.extract_strided_slice %8 {offsets = [0, 0, 1, 0, 0], sizes = [1, 8, 1, 8, 4], strides = [1, 1, 1, 1, 1]} : vector<1x8x2x8x4xf32> to vector<1x8x1x8x4xf32>
    %12 = vector.shape_cast %11 : vector<1x8x1x8x4xf32> to vector<1x8x8x4xf32>
    %13 = arith.maximumf %10, %12 : vector<1x8x8x4xf32>
    %14 = arith.index_cast %4 : i32 to index
    %c0_7 = arith.constant 0 : index
    %c0_8 = arith.constant 0 : index
    %c0_9 = arith.constant 0 : index
    %15 = vector.load %arg6[%14, %c0_7, %c0_8, %c0_9] : memref<2x8x8x4xf32, #tpu.memory_space<vmem>>, vector<1x8x8x4xf32>
    tpu.vector_store %arg6[%14, %c0_7, %c0_8, %c0_9], %13 {strides = array<i32>} : memref<2x8x8x4xf32, #tpu.memory_space<vmem>>, vector<1x8x8x4xf32>,
    %c0_10 = arith.constant 0 : index
    %c0_11 = arith.constant 0 : index
    %c0_12 = arith.constant 0 : index
    %c0_13 = arith.constant 0 : index
    %16 = vector.load %arg8[%c0_10, %c0_11, %c0_12, %c0_13] : memref<1x1x1x4xf32, #tpu.memory_space<vmem>>, vector<1x1x1x4xf32>
    %cst = arith.constant dense<0.000000e+00> : vector<4xf32>
    %17 = vector.multi_reduction <add>, %13, %cst [0, 1, 2] : vector<1x8x8x4xf32> to vector<4xf32>
    %18 = vector.shape_cast %17 : vector<4xf32> to vector<1x1x1x4xf32>
    %19 = arith.addf %16, %18 : vector<1x1x1x4xf32>
    %c0_14 = arith.constant 0 : index
    %c0_15 = arith.constant 0 : index
    %c0_16 = arith.constant 0 : index
    %c0_17 = arith.constant 0 : index
    %20 = vector.load %arg8[%c0_14, %c0_15, %c0_16, %c0_17] : memref<1x1x1x4xf32, #tpu.memory_space<vmem>>, vector<1x1x1x4xf32>
    tpu.vector_store %arg8[%c0_14, %c0_15, %c0_16, %c0_17], %19 {strides = array<i32>} : memref<1x1x1x4xf32, #tpu.memory_space<vmem>>, vector<1x1x1x4xf32>,
    %c0_18 = arith.constant 0 : index
    %c0_19 = arith.constant 0 : index
    %c0_20 = arith.constant 0 : index
    %c0_21 = arith.constant 0 : index
    %21 = vector.load %arg9[%c0_18, %c0_19, %c0_20, %c0_21] : memref<1x1x1x4xf32, #tpu.memory_space<vmem>>, vector<1x1x1x4xf32>
    %22 = arith.mulf %13, %13 : vector<1x8x8x4xf32>
    %cst_22 = arith.constant dense<0.000000e+00> : vector<4xf32>
    %23 = vector.multi_reduction <add>, %22, %cst_22 [0, 1, 2] : vector<1x8x8x4xf32> to vector<4xf32>
    %24 = vector.shape_cast %23 : vector<4xf32> to vector<1x1x1x4xf32>
    %25 = arith.addf %21, %24 : vector<1x1x1x4xf32>
    %c0_23 = arith.constant 0 : index
    %c0_24 = arith.constant 0 : index
    %c0_25 = arith.constant 0 : index
    %c0_26 = arith.constant 0 : index
    %26 = vector.load %arg9[%c0_23, %c0_24, %c0_25, %c0_26] : memref<1x1x1x4xf32, #tpu.memory_space<vmem>>, vector<1x1x1x4xf32>
    tpu.vector_store %arg9[%c0_23, %c0_24, %c0_25, %c0_26], %25 {strides = array<i32>} : memref<1x1x1x4xf32, #tpu.memory_space<vmem>>, vector<1x1x1x4xf32>,
    %c0_27 = arith.constant 0 : index
    %c0_28 = arith.constant 0 : index
    %c0_29 = arith.constant 0 : index
    %c0_30 = arith.constant 0 : index
    %27 = tpu.strided_load %arg3[%c0_27, %c0_28, %c0_29, %c0_30] {strides = array<i32: 1, 1, 2, 1>} : memref<1x16x16x4xf32, #tpu.memory_space<vmem>>, vector<1x16x8x4xf32>
    %c0_31 = arith.constant 0 : index
    %c0_32 = arith.constant 0 : index
    %c1_33 = arith.constant 1 : index
    %c0_34 = arith.constant 0 : index
    %28 = tpu.strided_load %arg3[%c0_31, %c0_32, %c1_33, %c0_34] {strides = array<i32: 1, 1, 2, 1>} : memref<1x16x16x4xf32, #tpu.memory_space<vmem>>, vector<1x16x8x4xf32>
    %29 = arith.maximumf %27, %28 : vector<1x16x8x4xf32>
    %30 = vector.shape_cast %29 : vector<1x16x8x4xf32> to vector<1x8x2x8x4xf32>
    %31 = vector.extract_strided_slice %30 {offsets = [0, 0, 0, 0, 0], sizes = [1, 8, 1, 8, 4], strides = [1, 1, 1, 1, 1]} : vector<1x8x2x8x4xf32> to vector<1x8x1x8x4xf32>
    %32 = vector.shape_cast %31 : vector<1x8x1x8x4xf32> to vector<1x8x8x4xf32>
    %33 = vector.extract_strided_slice %30 {offsets = [0, 0, 1, 0, 0], sizes = [1, 8, 1, 8, 4], strides = [1, 1, 1, 1, 1]} : vector<1x8x2x8x4xf32> to vector<1x8x1x8x4xf32>
    %34 = vector.shape_cast %33 : vector<1x8x1x8x4xf32> to vector<1x8x8x4xf32>
    %35 = arith.maximumf %32, %34 : vector<1x8x8x4xf32>
    %36 = arith.index_cast %4 : i32 to index
    %c0_35 = arith.constant 0 : index
    %c0_36 = arith.constant 0 : index
    %c0_37 = arith.constant 0 : index
    %37 = vector.load %arg7[%36, %c0_35, %c0_36, %c0_37] : memref<2x8x8x4xf32, #tpu.memory_space<vmem>>, vector<1x8x8x4xf32>
    tpu.vector_store %arg7[%36, %c0_35, %c0_36, %c0_37], %35 {strides = array<i32>} : memref<2x8x8x4xf32, #tpu.memory_space<vmem>>, vector<1x8x8x4xf32>,
    %c0_38 = arith.constant 0 : index
    %c0_39 = arith.constant 0 : index
    %c0_40 = arith.constant 0 : index
    %c0_41 = arith.constant 0 : index
    %38 = vector.load %arg10[%c0_38, %c0_39, %c0_40, %c0_41] : memref<1x1x1x4xf32, #tpu.memory_space<vmem>>, vector<1x1x1x4xf32>
    %cst_42 = arith.constant dense<0.000000e+00> : vector<4xf32>
    %39 = vector.multi_reduction <add>, %35, %cst_42 [0, 1, 2] : vector<1x8x8x4xf32> to vector<4xf32>
    %40 = vector.shape_cast %39 : vector<4xf32> to vector<1x1x1x4xf32>
    %41 = arith.addf %38, %40 : vector<1x1x1x4xf32>
    %c0_43 = arith.constant 0 : index
    %c0_44 = arith.constant 0 : index
    %c0_45 = arith.constant 0 : index
    %c0_46 = arith.constant 0 : index
    %42 = vector.load %arg10[%c0_43, %c0_44, %c0_45, %c0_46] : memref<1x1x1x4xf32, #tpu.memory_space<vmem>>, vector<1x1x1x4xf32>
    tpu.vector_store %arg10[%c0_43, %c0_44, %c0_45, %c0_46], %41 {strides = array<i32>} : memref<1x1x1x4xf32, #tpu.memory_space<vmem>>, vector<1x1x1x4xf32>,
    %c0_47 = arith.constant 0 : index
    %c0_48 = arith.constant 0 : index
    %c0_49 = arith.constant 0 : index
    %c0_50 = arith.constant 0 : index
    %43 = vector.load %arg11[%c0_47, %c0_48, %c0_49, %c0_50] : memref<1x1x1x4xf32, #tpu.memory_space<vmem>>, vector<1x1x1x4xf32>
    %44 = arith.mulf %35, %35 : vector<1x8x8x4xf32>
    %cst_51 = arith.constant dense<0.000000e+00> : vector<4xf32>
    %45 = vector.multi_reduction <add>, %44, %cst_51 [0, 1, 2] : vector<1x8x8x4xf32> to vector<4xf32>
    %46 = vector.shape_cast %45 : vector<4xf32> to vector<1x1x1x4xf32>
    %47 = arith.addf %43, %46 : vector<1x1x1x4xf32>
    %c0_52 = arith.constant 0 : index
    %c0_53 = arith.constant 0 : index
    %c0_54 = arith.constant 0 : index
    %c0_55 = arith.constant 0 : index
    %48 = vector.load %arg11[%c0_52, %c0_53, %c0_54, %c0_55] : memref<1x1x1x4xf32, #tpu.memory_space<vmem>>, vector<1x1x1x4xf32>
    tpu.vector_store %arg11[%c0_52, %c0_53, %c0_54, %c0_55], %47 {strides = array<i32>} : memref<1x1x1x4xf32, #tpu.memory_space<vmem>>, vector<1x1x1x4xf32>,
    %c1_i32_56 = arith.constant 1 : i32
    %49 = arith.cmpi eq, %arg1, %c1_i32_56 : i32
    %50 = arith.extui %49 : i1 to i32
    %c0_i32_57 = arith.constant 0 : i32
    %51 = arith.cmpi ne, %50, %c0_i32_57 : i32
    scf.if %51 {
      %c0_58 = arith.constant 0 : index
      %c0_59 = arith.constant 0 : index
      %c0_60 = arith.constant 0 : index
      %c0_61 = arith.constant 0 : index
      %52 = vector.load %arg4[%c0_58, %c0_59, %c0_60, %c0_61] : memref<1x1x1x4xf32, #tpu.memory_space<vmem>>, vector<1x1x1x4xf32>
      %c0_62 = arith.constant 0 : index
      %c0_63 = arith.constant 0 : index
      %c0_64 = arith.constant 0 : index
      %c0_65 = arith.constant 0 : index
      %53 = vector.load %arg5[%c0_62, %c0_63, %c0_64, %c0_65] : memref<1x1x1x4xf32, #tpu.memory_space<vmem>>, vector<1x1x1x4xf32>
      %c0_66 = arith.constant 0 : index
      %c0_67 = arith.constant 0 : index
      %c0_68 = arith.constant 0 : index
      %c0_69 = arith.constant 0 : index
      %54 = vector.load %arg8[%c0_66, %c0_67, %c0_68, %c0_69] : memref<1x1x1x4xf32, #tpu.memory_space<vmem>>, vector<1x1x1x4xf32>
      %cst_70 = arith.constant 7.812500e-03 : f32
      %55 = vector.broadcast %cst_70 : f32 to vector<1x1x1x4xf32>
      %56 = arith.mulf %54, %55 : vector<1x1x1x4xf32>
      %c0_71 = arith.constant 0 : index
      %c0_72 = arith.constant 0 : index
      %c0_73 = arith.constant 0 : index
      %c0_74 = arith.constant 0 : index
      %57 = vector.load %arg9[%c0_71, %c0_72, %c0_73, %c0_74] : memref<1x1x1x4xf32, #tpu.memory_space<vmem>>, vector<1x1x1x4xf32>
      %cst_75 = arith.constant 7.812500e-03 : f32
      %58 = vector.broadcast %cst_75 : f32 to vector<1x1x1x4xf32>
      %59 = arith.mulf %57, %58 : vector<1x1x1x4xf32>
      %60 = arith.mulf %56, %56 : vector<1x1x1x4xf32>
      %61 = arith.subf %59, %60 : vector<1x1x1x4xf32>
      %cst_76 = arith.constant 0.000000e+00 : f32
      %62 = vector.broadcast %cst_76 : f32 to vector<1x1x1x4xf32>
      %63 = arith.maximumf %61, %62 : vector<1x1x1x4xf32>
      %cst_77 = arith.constant 9.99999974E-6 : f32
      %64 = vector.broadcast %cst_77 : f32 to vector<1x1x1x4xf32>
      %65 = arith.addf %63, %64 : vector<1x1x1x4xf32>
      %66 = math.rsqrt %65 : vector<1x1x1x4xf32>
      %67 = arith.mulf %66, %52 : vector<1x1x1x4xf32>
      %68 = arith.mulf %56, %67 : vector<1x1x1x4xf32>
      %69 = arith.subf %53, %68 : vector<1x1x1x4xf32>
      %c0_78 = arith.constant 0 : index
      %c0_79 = arith.constant 0 : index
      %c0_80 = arith.constant 0 : index
      %c0_81 = arith.constant 0 : index
      %70 = vector.load %arg6[%c0_78, %c0_79, %c0_80, %c0_81] : memref<2x8x8x4xf32, #tpu.memory_space<vmem>>, vector<2x8x8x4xf32>
      %71 = vector.broadcast %67 : vector<1x1x1x4xf32> to vector<2x8x8x4xf32>
      %72 = arith.mulf %70, %71 : vector<2x8x8x4xf32>
      %73 = vector.broadcast %69 : vector<1x1x1x4xf32> to vector<2x8x8x4xf32>
      %74 = arith.addf %72, %73 : vector<2x8x8x4xf32>
      %c0_82 = arith.constant 0 : index
      %c0_83 = arith.constant 0 : index
      %c0_84 = arith.constant 0 : index
      %c0_85 = arith.constant 0 : index
      %75 = vector.load %arg6[%c0_82, %c0_83, %c0_84, %c0_85] : memref<2x8x8x4xf32, #tpu.memory_space<vmem>>, vector<2x8x8x4xf32>
      tpu.vector_store %arg6[%c0_82, %c0_83, %c0_84, %c0_85], %74 {strides = array<i32>} : memref<2x8x8x4xf32, #tpu.memory_space<vmem>>, vector<2x8x8x4xf32>,
      %c0_86 = arith.constant 0 : index
      %c0_87 = arith.constant 0 : index
      %c0_88 = arith.constant 0 : index
      %c0_89 = arith.constant 0 : index
      %76 = vector.load %arg10[%c0_86, %c0_87, %c0_88, %c0_89] : memref<1x1x1x4xf32, #tpu.memory_space<vmem>>, vector<1x1x1x4xf32>
      %cst_90 = arith.constant 7.812500e-03 : f32
      %77 = vector.broadcast %cst_90 : f32 to vector<1x1x1x4xf32>
      %78 = arith.mulf %76, %77 : vector<1x1x1x4xf32>
      %c0_91 = arith.constant 0 : index
      %c0_92 = arith.constant 0 : index
      %c0_93 = arith.constant 0 : index
      %c0_94 = arith.constant 0 : index
      %79 = vector.load %arg11[%c0_91, %c0_92, %c0_93, %c0_94] : memref<1x1x1x4xf32, #tpu.memory_space<vmem>>, vector<1x1x1x4xf32>
      %cst_95 = arith.constant 7.812500e-03 : f32
      %80 = vector.broadcast %cst_95 : f32 to vector<1x1x1x4xf32>
      %81 = arith.mulf %79, %80 : vector<1x1x1x4xf32>
      %82 = arith.mulf %78, %78 : vector<1x1x1x4xf32>
      %83 = arith.subf %81, %82 : vector<1x1x1x4xf32>
      %cst_96 = arith.constant 0.000000e+00 : f32
      %84 = vector.broadcast %cst_96 : f32 to vector<1x1x1x4xf32>
      %85 = arith.maximumf %83, %84 : vector<1x1x1x4xf32>
      %cst_97 = arith.constant 9.99999974E-6 : f32
      %86 = vector.broadcast %cst_97 : f32 to vector<1x1x1x4xf32>
      %87 = arith.addf %85, %86 : vector<1x1x1x4xf32>
      %88 = math.rsqrt %87 : vector<1x1x1x4xf32>
      %89 = arith.mulf %88, %52 : vector<1x1x1x4xf32>
      %90 = arith.mulf %78, %89 : vector<1x1x1x4xf32>
      %91 = arith.subf %53, %90 : vector<1x1x1x4xf32>
      %c0_98 = arith.constant 0 : index
      %c0_99 = arith.constant 0 : index
      %c0_100 = arith.constant 0 : index
      %c0_101 = arith.constant 0 : index
      %92 = vector.load %arg7[%c0_98, %c0_99, %c0_100, %c0_101] : memref<2x8x8x4xf32, #tpu.memory_space<vmem>>, vector<2x8x8x4xf32>
      %93 = vector.broadcast %89 : vector<1x1x1x4xf32> to vector<2x8x8x4xf32>
      %94 = arith.mulf %92, %93 : vector<2x8x8x4xf32>
      %95 = vector.broadcast %91 : vector<1x1x1x4xf32> to vector<2x8x8x4xf32>
      %96 = arith.addf %94, %95 : vector<2x8x8x4xf32>
      %c0_102 = arith.constant 0 : index
      %c0_103 = arith.constant 0 : index
      %c0_104 = arith.constant 0 : index
      %c0_105 = arith.constant 0 : index
      %97 = vector.load %arg7[%c0_102, %c0_103, %c0_104, %c0_105] : memref<2x8x8x4xf32, #tpu.memory_space<vmem>>, vector<2x8x8x4xf32>
      tpu.vector_store %arg7[%c0_102, %c0_103, %c0_104, %c0_105], %96 {strides = array<i32>} : memref<2x8x8x4xf32, #tpu.memory_space<vmem>>, vector<2x8x8x4xf32>,
    } else {
    }
    return
  }
  func.func @transform_0(%arg0: i32, %arg1: i32) -> (i32, i32, i32, i32) {
    %c0_i32 = arith.constant 0 : i32
    %c0_i32_0 = arith.constant 0 : i32
    %c0_i32_1 = arith.constant 0 : i32
    return %arg1, %c0_i32, %c0_i32_0, %arg0 : i32, i32, i32, i32
  }
  func.func @transform_1(%arg0: i32, %arg1: i32) -> (i32, i32, i32, i32) {
    %c0_i32 = arith.constant 0 : i32
    %c0_i32_0 = arith.constant 0 : i32
    %c0_i32_1 = arith.constant 0 : i32
    return %arg1, %c0_i32, %c0_i32_0, %arg0 : i32, i32, i32, i32
  }
  func.func @transform_2(%arg0: i32, %arg1: i32) -> (i32, i32, i32, i32) {
    %c0_i32 = arith.constant 0 : i32
    %c0_i32_0 = arith.constant 0 : i32
    %c0_i32_1 = arith.constant 0 : i32
    %c0_i32_2 = arith.constant 0 : i32
    return %c0_i32, %c0_i32_0, %c0_i32_1, %arg0 : i32, i32, i32, i32
  }
  func.func @transform_3(%arg0: i32, %arg1: i32) -> (i32, i32, i32, i32) {
    %c0_i32 = arith.constant 0 : i32
    %c0_i32_0 = arith.constant 0 : i32
    %c0_i32_1 = arith.constant 0 : i32
    %c0_i32_2 = arith.constant 0 : i32
    return %c0_i32, %c0_i32_0, %c0_i32_1, %arg0 : i32, i32, i32, i32
  }
  func.func @transform_4(%arg0: i32, %arg1: i32) -> (i32, i32, i32, i32) {
    %c0_i32 = arith.constant 0 : i32
    %c0_i32_0 = arith.constant 0 : i32
    %c0_i32_1 = arith.constant 0 : i32
    %c0_i32_2 = arith.constant 0 : i32
    return %c0_i32, %c0_i32_0, %c0_i32_1, %arg0 : i32, i32, i32, i32
  }
  func.func @transform_5(%arg0: i32, %arg1: i32) -> (i32, i32, i32, i32) {
    %c0_i32 = arith.constant 0 : i32
    %c0_i32_0 = arith.constant 0 : i32
    %c0_i32_1 = arith.constant 0 : i32
    %c0_i32_2 = arith.constant 0 : i32
    return %c0_i32, %c0_i32_0, %c0_i32_1, %arg0 : i32, i32, i32, i32
  }
}

</mosaic_0001>

<bundles_post_ra>
// kernel: tpu_custom_call.1
= control target key start
LH: loop header
LB: loop body
LE: loop exit
PB: predicated region body
PF: predicated region fallthrough
CT: control target
= control target key end

     0   :  { %s1124_s18 = smov 0   ;;  %s1126_s19 = smov 0   ;;  %s1613_s0 = inlined_call_operand.vmem [shape: f32[2,16,16,4], index: 0, kind: input, shape index: {}]   ;;  %s1614_s1 = inlined_call_operand.vmem [shape: f32[2,16,16,4], index: 1, kind: input, shape index: {}]   ;;  %s1615_s2 = inlined_call_operand.vmem [shape: f32[1,1,1,4], index: 2, kind: input, shape index: {}]   ;;  %s1616_s3 = inlined_call_operand.vmem [shape: f32[1,1,1,4], index: 3, kind: input, shape index: {}]   ;;  %s1617_s4 = inlined_call_operand.vmem [shape: f32[2,8,8,4], index: 4, kind: output, shape index: {0}]   ;;  %s1618_s5 = inlined_call_operand.vmem [shape: f32[2,8,8,4], index: 5, kind: output, shape index: {1}]  }
   0x1   :  { %s1128_s20 = smov 0  }
   0x2 LB: > { %s25_s21 = sadd.s32 1, %s1087_s19  ;;  %p964_p0 = scmp.ge.s32.totalorder %s1091_s20, 1  ;;  %s1091_s20 = sphi %s1128_s20, %s16_s20   ;;  %s1087_s19 = sphi %s1126_s19, %s1622_s19   ;;  %s1083_s18 = sphi %s1124_s18, %s1621_s18  }
   0x3   : > { %p26_p1 = scmp.ge.s32.totalorder %s25_s21, 2  ;;  %p238_p2 = scmp.lt.s32.totalorder %s1091_s20, 3 }
   0x5   : > { %s1624_s21 = smov (%p26_p1, %s25_s21), 0  ;;  %p239_p3 = pnand %p964_p0, %p238_p2 }
   0x6   : > { %p286_p4 = scmp.lt.s32.totalorder (!%p239_p3), %s1083_s18, 1  ;;  %p969_p5 = scmp.ne.s32.totalorder (!%p239_p3), %s1083_s18, 0 }
   0x7   : > { %242 = sbr.rel (%p239_p3) target bundleno = 153 (0x99), region = 36 }
   0xc   : > { %s287_s22 = scalar_select %p286_p4, %s1083_s18, 1 }
   0xd   : > { %319 = sbr.rel (%p969_p5) target bundleno = 23 (0x17), region = 40 }
   0xe   : > { %s1038_s23 = sshll.u32 %s287_s22, 8 }
   0xf   : > { %s1149_s26 = scalar_lea.vmem %s1613_s0, %s1038_s23  ;;  %s1154_s29 = scalar_lea.vmem %s1614_s1, %s1038_s23 }
  0x12   : > { %vm320_vm0 = vcmask 24576   ;;  %v1093_v0 = vmov 0.0  }
  0x13   : > { %321 = vst.msk [vmem:[#allocation2] sm:$0x1] %vm320_vm0, %v1093_v0 }
  0x14   : > { %322 = vst.msk [vmem:[#allocation3] sm:$0x1] %vm320_vm0, %v1093_v0 }
  0x15   : > { %323 = vst.msk [vmem:[#allocation4] sm:$0x1] %vm320_vm0, %v1093_v0 }
  0x16   : > { %324 = vst.msk [vmem:[#allocation5] sm:$0x1] %vm320_vm0, %v1093_v0 }
  0x17 PF: > { %v325_v1 = vld [vmem:[%s1149_s26] ss:$2 sm:$0xff]  ;;  %v970_v2 = vld [vmem:[%s1149_s26 + $0x10] ss:$2 sm:$0xff]  ;;  %v985_v3 = vld [vmem:[%s1149_s26 + $0x1] ss:$2 sm:$0xff] }
  0x18   : > { %v986_v4 = vld [vmem:[%s1149_s26 + $0x11] ss:$2 sm:$0xff]  ;;  %v388_v5 = vmax.f32 %v325_v1, %v985_v3  ;;  %s1001_s30 = sshll.u32 %s1083_s18, 6  ;;  %vm414_vm1 = vcmask 31744   ;;  %v971_v6 = vld [vmem:[%s1149_s26 + $0x20] ss:$2 sm:$0xff] }
  0x19   : > { %v389_v7 = vmax.f32 %v970_v2, %v986_v4  ;;  %v972_v8 = vld [vmem:[%s1149_s26 + $0x30] ss:$2 sm:$0xff]  ;;  %v987_v9 = vld [vmem:[%s1149_s26 + $0x21] ss:$2 sm:$0xff]  ;;  %v988_v10 = vld [vmem:[%s1149_s26 + $0x31] ss:$2 sm:$0xff]  ;;  %s1171_s8 = scalar_lea.vmem %s1617_s4, %s1001_s30  ;;  %s1244_s11 = scalar_lea.vmem %s1618_s5, %s1001_s30 }
  0x1a   : > { %v390_v11 = vmax.f32 %v971_v6, %v987_v9  ;;  %v391_v12 = vmax.f32 %v972_v8, %v988_v10  ;;  %v973_v13 = vld [vmem:[%s1149_s26 + $0x40] ss:$2 sm:$0xff]  ;;  %v974_v14 = vld [vmem:[%s1149_s26 + $0x50] ss:$2 sm:$0xff]  ;;  %v989_v15 = vld [vmem:[%s1149_s26 + $0x41] ss:$2 sm:$0xff] }
  0x1b   : > { %v404_v16 = vmax.f32 %v388_v5, %v389_v7  ;;  %v990_v17 = vld [vmem:[%s1149_s26 + $0x51] ss:$2 sm:$0xff]  ;;  %v392_v18 = vmax.f32 %v973_v13, %v989_v15  ;;  %v975_v19 = vld [vmem:[%s1149_s26 + $0x60] ss:$2 sm:$0xff]  ;;  %v976_v20 = vld [vmem:[%s1149_s26 + $0x70] ss:$2 sm:$0xff] }
  0x1c   : > { %v405_v21 = vmax.f32 %v390_v11, %v391_v12  ;;  %v393_v22 = vmax.f32 %v974_v14, %v990_v17  ;;  %v991_v23 = vld [vmem:[%s1149_s26 + $0x61] ss:$2 sm:$0xff]  ;;  %v992_v24 = vld [vmem:[%s1149_s26 + $0x71] ss:$2 sm:$0xff]  ;;  %v977_v25 = vld [vmem:[%s1149_s26 + $0x80] ss:$2 sm:$0xff] }
  0x1d   : > { %415 = vst.msk [vmem:[%s1171_s8] sm:$0xff] %vm414_vm1, %v404_v16  ;;  %v424_v26 = vsel %vm414_vm1, %v404_v16, 0.0  ;;  %v449_v27 = vmul.f32 %v404_v16, %v404_v16  ;;  %v394_v28 = vmax.f32 %v975_v19, %v991_v23  ;;  %v395_v29 = vmax.f32 %v976_v20, %v992_v24  ;;  %v978_v30 = vld [vmem:[%s1149_s26 + $0x90] ss:$2 sm:$0xff]  ;;  %v993_v31 = vld [vmem:[%s1149_s26 + $0x81] ss:$2 sm:$0xff] }
  0x1e   : > { %416 = vst.msk [vmem:[%s1171_s8 + $0x8] sm:$0xff] %vm414_vm1, %v405_v21  ;;  %v425_v32 = vsel %vm414_vm1, %v405_v21, 0.0  ;;  %v450_v33 = vmul.f32 %v405_v21, %v405_v21  ;;  %v406_v34 = vmax.f32 %v392_v18, %v393_v22  ;;  %v994_v35 = vld [vmem:[%s1149_s26 + $0x91] ss:$2 sm:$0xff]  ;;  %v396_v36 = vmax.f32 %v977_v25, %v993_v31  ;;  %v979_v37 = vld [vmem:[%s1149_s26 + $0xa0] ss:$2 sm:$0xff] }
  0x1f   : > { %v457_v38 = vsel %vm414_vm1, %v449_v27, 0.0  ;;  %v426_v39 = vadd.f32 %v425_v32, %v424_v26  ;;  %v407_v40 = vmax.f32 %v394_v28, %v395_v29  ;;  %v397_v41 = vmax.f32 %v978_v30, %v994_v35  ;;  %v980_v42 = vld [vmem:[%s1149_s26 + $0xb0] ss:$2 sm:$0xff]  ;;  %v995_v43 = vld [vmem:[%s1149_s26 + $0xa1] ss:$2 sm:$0xff]  ;;  %p1033_p6 = scmp.ne.s32.totalorder %s1083_s18, 1 }
  0x20   : > { %v458_v44 = vsel %vm414_vm1, %v450_v33, 0.0  ;;  %417 = vst.msk [vmem:[%s1171_s8 + $0x10] sm:$0xff] %vm414_vm1, %v406_v34  ;;  %v427_v45 = vsel %vm414_vm1, %v406_v34, 0.0  ;;  %v451_v46 = vmul.f32 %v406_v34, %v406_v34  ;;  %v996_v47 = vld [vmem:[%s1149_s26 + $0xb1] ss:$2 sm:$0xff]  ;;  %v398_v48 = vmax.f32 %v979_v37, %v995_v43 }
  0x21   : > { %v459_v49 = vadd.f32 %v458_v44, %v457_v38  ;;  %v428_v50 = vadd.f32 %v427_v45, %v426_v39  ;;  %418 = vst.msk [vmem:[%s1171_s8 + $0x18] sm:$0xff] %vm414_vm1, %v407_v40  ;;  %v429_v51 = vsel %vm414_vm1, %v407_v40, 0.0  ;;  %v452_v52 = vmul.f32 %v407_v40, %v407_v40  ;;  %v981_v53 = vld [vmem:[%s1149_s26 + $0xc0] ss:$2 sm:$0xff]  ;;  %v982_v54 = vld [vmem:[%s1149_s26 + $0xd0] ss:$2 sm:$0xff] }
  0x22   : > { %v460_v55 = vsel %vm414_vm1, %v451_v46, 0.0  ;;  %v408_v56 = vmax.f32 %v396_v36, %v397_v41  ;;  %v399_v57 = vmax.f32 %v980_v42, %v996_v47  ;;  %v997_v58 = vld [vmem:[%s1149_s26 + $0xc1] ss:$2 sm:$0xff]  ;;  %v998_v59 = vld [vmem:[%s1149_s26 + $0xd1] ss:$2 sm:$0xff]  ;;  %vm446_vm2 = vcmask 24576  }
  0x23   : > { %v461_v60 = vadd.f32 %v460_v55, %v459_v49  ;;  %v430_v61 = vadd.f32 %v429_v51, %v428_v50  ;;  %v462_v62 = vsel %vm414_vm1, %v452_v52, 0.0  ;;  %v400_v63 = vmax.f32 %v981_v53, %v997_v58  ;;  %v983_v0 = vld [vmem:[%s1149_s26 + $0xe0] ss:$2 sm:$0xff]  ;;  %v984_v1 = vld [vmem:[%s1149_s26 + $0xf0] ss:$2 sm:$0xff] }
  0x24   : > { %419 = vst.msk [vmem:[%s1171_s8 + $0x20] sm:$0xff] %vm414_vm1, %v408_v56  ;;  %v431_v2 = vsel %vm414_vm1, %v408_v56, 0.0  ;;  %v453_v3 = vmul.f32 %v408_v56, %v408_v56  ;;  %v409_v4 = vmax.f32 %v398_v48, %v399_v57  ;;  %v401_v5 = vmax.f32 %v982_v54, %v998_v59  ;;  %v999_v6 = vld [vmem:[%s1149_s26 + $0xe1] ss:$2 sm:$0xff]  ;;  %v1000_v7 = vld [vmem:[%s1149_s26 + $0xf1] ss:$2 sm:$0xff] }
  0x25   : > { %v463_v8 = vadd.f32 %v462_v62, %v461_v60  ;;  %v432_v9 = vadd.f32 %v431_v2, %v430_v61  ;;  %v402_v10 = vmax.f32 %v983_v0, %v999_v6  ;;  %v403_v11 = vmax.f32 %v984_v1, %v1000_v7  ;;  %v480_v12 = vld [vmem:[%s1154_s29] ss:$2 sm:$0xff]  ;;  %v1002_v17 = vld [vmem:[%s1154_s29 + $0x10] ss:$2 sm:$0xff]  ;;  %v1017_v21 = vld [vmem:[%s1154_s29 + $0x1] ss:$2 sm:$0xff] }
  0x26   : > { %v464_v13 = vsel %vm414_vm1, %v453_v3, 0.0  ;;  %420 = vst.msk [vmem:[%s1171_s8 + $0x28] sm:$0xff] %vm414_vm1, %v409_v4  ;;  %v433_v14 = vsel %vm414_vm1, %v409_v4, 0.0  ;;  %v454_v15 = vmul.f32 %v409_v4, %v409_v4  ;;  %v410_v16 = vmax.f32 %v400_v63, %v401_v5  ;;  %v1018_v22 = vld [vmem:[%s1154_s29 + $0x11] ss:$2 sm:$0xff] }
  0x27   : > { %v465_v18 = vadd.f32 %v464_v13, %v463_v8  ;;  %v434_v19 = vadd.f32 %v433_v14, %v432_v9  ;;  %v411_v20 = vmax.f32 %v402_v10, %v403_v11  ;;  %v1003_v23 = vld [vmem:[%s1154_s29 + $0x20] ss:$2 sm:$0xff]  ;;  %v543_v27 = vmax.f32 %v480_v12, %v1017_v21  ;;  %v1004_v28 = vld [vmem:[%s1154_s29 + $0x30] ss:$2 sm:$0xff]  ;;  %v1019_v33 = vld [vmem:[%s1154_s29 + $0x21] ss:$2 sm:$0xff] }
  0x28   : > { %v466_v24 = vsel %vm414_vm1, %v454_v15, 0.0  ;;  %421 = vst.msk [vmem:[%s1171_s8 + $0x30] sm:$0xff] %vm414_vm1, %v410_v16  ;;  %v435_v25 = vsel %vm414_vm1, %v410_v16, 0.0  ;;  %v455_v26 = vmul.f32 %v410_v16, %v410_v16  ;;  %v1020_v34 = vld [vmem:[%s1154_s29 + $0x31] ss:$2 sm:$0xff]  ;;  %v544_v36 = vmax.f32 %v1002_v17, %v1018_v22 }
  0x29   : > { %v467_v29 = vadd.f32 %v466_v24, %v465_v18  ;;  %v436_v30 = vadd.f32 %v435_v25, %v434_v19  ;;  %422 = vst.msk [vmem:[%s1171_s8 + $0x38] sm:$0xff] %vm414_vm1, %v411_v20  ;;  %v437_v31 = vsel %vm414_vm1, %v411_v20, 0.0  ;;  %v456_v32 = vmul.f32 %v411_v20, %v411_v20  ;;  %v1005_v39 = vld [vmem:[%s1154_s29 + $0x40] ss:$2 sm:$0xff]  ;;  %v1006_v40 = vld [vmem:[%s1154_s29 + $0x50] ss:$2 sm:$0xff] }
  0x2a   : > { %v468_v35 = vsel %vm414_vm1, %v455_v26, 0.0  ;;  %v545_v37 = vmax.f32 %v1003_v23, %v1019_v33  ;;  %v546_v38 = vmax.f32 %v1004_v28, %v1020_v34  ;;  %v1021_v44 = vld [vmem:[%s1154_s29 + $0x41] ss:$2 sm:$0xff]  ;;  %v1022_v45 = vld [vmem:[%s1154_s29 + $0x51] ss:$2 sm:$0xff]  ;;  %v559_v46 = vmax.f32 %v543_v27, %v544_v36 }
  0x2b   : > { %v469_v41 = vadd.f32 %v468_v35, %v467_v29  ;;  %v438_v42 = vadd.f32 %v437_v31, %v436_v30  ;;  %v470_v43 = vsel %vm414_vm1, %v456_v32, 0.0  ;;  %v547_v48 = vmax.f32 %v1005_v39, %v1021_v44  ;;  %v1007_v50 = vld [vmem:[%s1154_s29 + $0x60] ss:$2 sm:$0xff]  ;;  %v1008_v51 = vld [vmem:[%s1154_s29 + $0x70] ss:$2 sm:$0xff] }
  0x2c   : > { %v560_v47 = vmax.f32 %v545_v37, %v546_v38  ;;  %v548_v49 = vmax.f32 %v1006_v40, %v1022_v45  ;;  %v1023_v52 = vld [vmem:[%s1154_s29 + $0x61] ss:$2 sm:$0xff]  ;;  %v1024_v55 = vld [vmem:[%s1154_s29 + $0x71] ss:$2 sm:$0xff]  ;;  %v1009_v57 = vld [vmem:[%s1154_s29 + $0x80] ss:$2 sm:$0xff]  ;;  %v601_v59 = vmul.f32 %v559_v46, %v559_v46 }
  0x2d   : > { %v439_v53 = vrot.slane %v438_v42, 4  ;;  %v471_v54 = vadd.f32 %v470_v43, %v469_v41  ;;  %v549_v56 = vmax.f32 %v1007_v50, %v1023_v52  ;;  %568 = vst.msk [vmem:[%s1244_s11] sm:$0xff] %vm414_vm1, %v559_v46  ;;  %v577_v58 = vsel %vm414_vm1, %v559_v46, 0.0  ;;  %v1010_v62 = vld [vmem:[%s1154_s29 + $0x90] ss:$2 sm:$0xff] }
  0x2e   : > { %v578_v60 = vsel %vm414_vm1, %v560_v47, 0.0  ;;  %v602_v61 = vmul.f32 %v560_v47, %v560_v47  ;;  %569 = vst.msk [vmem:[%s1244_s11 + $0x8] sm:$0xff] %vm414_vm1, %v560_v47  ;;  %v561_v2 = vmax.f32 %v547_v48, %v548_v49  ;;  %v1025_v3 = vld [vmem:[%s1154_s29 + $0x81] ss:$2 sm:$0xff]  ;;  %v1026_v4 = vld [vmem:[%s1154_s29 + $0x91] ss:$2 sm:$0xff]  ;;  %v550_v7 = vmax.f32 %v1008_v51, %v1024_v55 }
  0x2f   : > { %v440_v63 = vadd.f32 %v439_v53, %v438_v42  ;;  %v472_v0 = vrot.slane %v471_v54, 4  ;;  %v579_v1 = vadd.f32 %v578_v60, %v577_v58  ;;  %v609_v5 = vsel %vm414_vm1, %v601_v59, 0.0  ;;  %v1011_v9 = vld [vmem:[%s1154_s29 + $0xa0] ss:$2 sm:$0xff]  ;;  %v1012_v10 = vld [vmem:[%s1154_s29 + $0xb0] ss:$2 sm:$0xff] }
  0x30   : > { %v610_v6 = vsel %vm414_vm1, %v602_v61, 0.0  ;;  %v551_v8 = vmax.f32 %v1009_v57, %v1025_v3  ;;  %570 = vst.msk [vmem:[%s1244_s11 + $0x10] sm:$0xff] %vm414_vm1, %v561_v2  ;;  %v580_v14 = vsel %vm414_vm1, %v561_v2, 0.0  ;;  %v1027_v15 = vld [vmem:[%s1154_s29 + $0xa1] ss:$2 sm:$0xff]  ;;  %v603_v17 = vmul.f32 %v561_v2, %v561_v2 }
  0x31   : > { %v441_v11 = vrot.slane %v440_v63, 2  ;;  %v473_v12 = vadd.f32 %v472_v0, %v471_v54  ;;  %v611_v13 = vadd.f32 %v610_v6, %v609_v5  ;;  %v581_v16 = vadd.f32 %v580_v14, %v579_v1  ;;  %v1028_v20 = vld [vmem:[%s1154_s29 + $0xb1] ss:$2 sm:$0xff]  ;;  %v1013_v25 = vld [vmem:[%s1154_s29 + $0xc0] ss:$2 sm:$0xff] }
  0x32   : > { %v562_v18 = vmax.f32 %v549_v56, %v550_v7  ;;  %v552_v19 = vmax.f32 %v1010_v62, %v1026_v4  ;;  %v553_v23 = vmax.f32 %v1011_v9, %v1027_v15  ;;  %v554_v24 = vmax.f32 %v1012_v10, %v1028_v20  ;;  %v423_v26 = vld [vmem:[#allocation2] sm:$0x1]  ;;  %v1029_v31 = vld [vmem:[%s1154_s29 + $0xc1] ss:$2 sm:$0xff]  ;;  %v1014_v36 = vld [vmem:[%s1154_s29 + $0xd0] ss:$2 sm:$0xff] }
  0x33   : > { %v442_v21 = vadd.f32 %v441_v11, %v440_v63  ;;  %v474_v22 = vrot.slane %v473_v12, 2  ;;  %v612_v27 = vsel %vm414_vm1, %v603_v17, 0.0  ;;  %v1030_v37 = vld [vmem:[%s1154_s29 + $0xd1] ss:$2 sm:$0xff]  ;;  %v1015_v38 = vld [vmem:[%s1154_s29 + $0xe0] ss:$2 sm:$0xff]  ;;  %v555_v54 = vmax.f32 %v1013_v25, %v1029_v31 }
  0x34   : > { %571 = vst.msk [vmem:[%s1244_s11 + $0x18] sm:$0xff] %vm414_vm1, %v562_v18  ;;  %v582_v28 = vsel %vm414_vm1, %v562_v18, 0.0  ;;  %v604_v29 = vmul.f32 %v562_v18, %v562_v18  ;;  %v563_v30 = vmax.f32 %v551_v8, %v552_v19  ;;  %v613_v34 = vadd.f32 %v612_v27, %v611_v13  ;;  %v1016_v43 = vld [vmem:[%s1154_s29 + $0xf0] ss:$2 sm:$0xff]  ;;  %v1031_v48 = vld [vmem:[%s1154_s29 + $0xe1] ss:$2 sm:$0xff] }
  0x35   : > { %v443_v32 = vrot.slane %v442_v21, 1  ;;  %v475_v33 = vadd.f32 %v474_v22, %v473_v12  ;;  %v583_v35 = vadd.f32 %v582_v28, %v581_v16  ;;  %v564_v42 = vmax.f32 %v553_v23, %v554_v24  ;;  %v1032_v49 = vld [vmem:[%s1154_s29 + $0xf1] ss:$2 sm:$0xff]  ;;  %v448_v50 = vld [vmem:[#allocation3] sm:$0x1] }
  0x36   : > { %v614_v39 = vsel %vm414_vm1, %v604_v29, 0.0  ;;  %572 = vst.msk [vmem:[%s1244_s11 + $0x20] sm:$0xff] %vm414_vm1, %v563_v30  ;;  %v584_v40 = vsel %vm414_vm1, %v563_v30, 0.0  ;;  %v605_v41 = vmul.f32 %v563_v30, %v563_v30  ;;  %v556_v59 = vmax.f32 %v1014_v36, %v1030_v37  ;;  %v576_v22 = vld [vmem:[#allocation4] sm:$0x1] }
  0x37   : > { %v444_v44 = vadd.f32 %v443_v32, %v442_v21  ;;  %v476_v45 = vrot.slane %v475_v33, 1  ;;  %v615_v46 = vadd.f32 %v614_v39, %v613_v34  ;;  %v585_v47 = vadd.f32 %v584_v40, %v583_v35  ;;  %573 = vst.msk [vmem:[%s1244_s11 + $0x28] sm:$0xff] %vm414_vm1, %v564_v42  ;;  %v600_v25 = vld [vmem:[#allocation5] sm:$0x1] }
  0x38   : > { %v616_v51 = vsel %vm414_vm1, %v605_v41, 0.0  ;;  %v586_v52 = vsel %vm414_vm1, %v564_v42, 0.0  ;;  %v606_v53 = vmul.f32 %v564_v42, %v564_v42  ;;  %v557_v60 = vmax.f32 %v1015_v38, %v1031_v48 }
  0x39   : > { %v445_v55 = vadd.f32 %v444_v44, %v423_v26  ;;  %v477_v56 = vadd.f32 %v476_v45, %v475_v33  ;;  %v617_v57 = vadd.f32 %v616_v51, %v615_v46  ;;  %v558_v61 = vmax.f32 %v1016_v43, %v1032_v49 }
  0x3a   : > { %v618_v58 = vsel %vm414_vm1, %v606_v53, 0.0  ;;  %v587_v63 = vadd.f32 %v586_v52, %v585_v47  ;;  %v565_v0 = vmax.f32 %v555_v54, %v556_v59 }
  0x3b   : > { %447 = vst.msk [vmem:[#allocation2] sm:$0x1] %vm446_vm2, %v445_v55  ;;  %v478_v62 = vadd.f32 %v477_v56, %v448_v50  ;;  %v566_v1 = vmax.f32 %v557_v60, %v558_v61  ;;  %v619_v2 = vadd.f32 %v618_v58, %v617_v57 }
  0x3c   : > { %574 = vst.msk [vmem:[%s1244_s11 + $0x30] sm:$0xff] %vm414_vm1, %v565_v0  ;;  %v588_v3 = vsel %vm414_vm1, %v565_v0, 0.0  ;;  %v607_v4 = vmul.f32 %v565_v0, %v565_v0 }
  0x3d   : > { %479 = vst.msk [vmem:[#allocation3] sm:$0x1] %vm446_vm2, %v478_v62  ;;  %v590_v5 = vsel %vm414_vm1, %v566_v1, 0.0  ;;  %v608_v6 = vmul.f32 %v566_v1, %v566_v1  ;;  %v589_v7 = vadd.f32 %v588_v3, %v587_v63 }
  0x3e   : > { %575 = vst.msk [vmem:[%s1244_s11 + $0x38] sm:$0xff] %vm414_vm1, %v566_v1  ;;  %v620_v8 = vsel %vm414_vm1, %v607_v4, 0.0 }
  0x3f   : > { %v622_v9 = vsel %vm414_vm1, %v608_v6, 0.0  ;;  %v621_v10 = vadd.f32 %v620_v8, %v619_v2  ;;  %v591_v11 = vadd.f32 %v590_v5, %v589_v7 }
  0x41   : > { %v592_v12 = vrot.slane %v591_v11, 4  ;;  %v623_v13 = vadd.f32 %v622_v9, %v621_v10 }
  0x43   : > { %v593_v14 = vadd.f32 %v592_v12, %v591_v11  ;;  %v624_v15 = vrot.slane %v623_v13, 4 }
  0x45   : > { %v594_v16 = vrot.slane %v593_v14, 2  ;;  %v625_v17 = vadd.f32 %v624_v15, %v623_v13 }
  0x47   : > { %v595_v18 = vadd.f32 %v594_v16, %v593_v14  ;;  %v626_v19 = vrot.slane %v625_v17, 2 }
  0x49   : > { %v596_v20 = vrot.slane %v595_v18, 1  ;;  %v627_v21 = vadd.f32 %v626_v19, %v625_v17 }
  0x4b   : > { %v597_v23 = vadd.f32 %v596_v20, %v595_v18  ;;  %v628_v24 = vrot.slane %v627_v21, 1 }
  0x4d   : > { %v598_v26 = vadd.f32 %v597_v23, %v576_v22  ;;  %v629_v27 = vadd.f32 %v628_v24, %v627_v21  ;;  %635 = sbr.rel (%p1033_p6) target bundleno = 153 (0x99), region = 44 }
  0x4f   : > { %599 = vst.msk [vmem:[#allocation4] sm:$0x1] %vm446_vm2, %v598_v26  ;;  %v630_v28 = vadd.f32 %v629_v27, %v600_v25 }
  0x51   : > { %631 = vst.msk [vmem:[#allocation5] sm:$0x1] %vm446_vm2, %v630_v28 }
  0x52   : > { %v638_v29 = vld [vmem:[#allocation2] sm:$0x1]  ;;  %v640_v31 = vld [vmem:[#allocation3] sm:$0x1]  ;;  %v660_v63 = vld [vmem:[%s1617_s4 + $0x8] sm:$0xff] }
  0x53   : > { %v639_v30 = vmul.f32 0.0078125, %v638_v29  ;;  %v641_v33 = vmul.f32 0.0078125, %v640_v31  ;;  %v636_v55 = vld [vmem:[%s1615_s2] sm:$0x1]  ;;  %v661_v0 = vld [vmem:[%s1617_s4 + $0x10] sm:$0xff]  ;;  %v662_v3 = vld [vmem:[%s1617_s4 + $0x18] sm:$0xff] }
  0x54   : > { %v1315_v59 = vld [vmem:[%s1616_s3] sm:$0x1]  ;;  %v664_v10 = vld [vmem:[%s1617_s4 + $0x28] sm:$0xff]  ;;  %v665_v12 = vld [vmem:[%s1617_s4 + $0x30] sm:$0xff] }
  0x55   : > { %v642_v36 = vmul.f32 %v639_v30, %v639_v30  ;;  %v659_v62 = vld [vmem:[%s1617_s4] sm:$0xff]  ;;  %v666_v15 = vld [vmem:[%s1617_s4 + $0x38] sm:$0xff]  ;;  %v668_v23 = vld [vmem:[%s1617_s4 + $0x48] sm:$0xff] }
  0x56   : > { %v729_v32 = vld [vmem:[#allocation4] sm:$0x1]  ;;  %v669_v26 = vld [vmem:[%s1617_s4 + $0x50] sm:$0xff]  ;;  %v670_v29 = vld [vmem:[%s1617_s4 + $0x58] sm:$0xff] }
  0x57   : > { %v1305_v34 = vmul.f32 0.0078125, %v729_v32  ;;  %v643_v39 = vsub.f32 %v641_v33, %v642_v36  ;;  %v663_v4 = vld [vmem:[%s1617_s4 + $0x20] sm:$0xff]  ;;  %v672_v36 = vld [vmem:[%s1617_s4 + $0x68] sm:$0xff] }
  0x58   : > { %v731_v35 = vld [vmem:[#allocation5] sm:$0x1] }
  0x59   : > { %v732_v37 = vmul.f32 0.0078125, %v731_v35  ;;  %v733_v38 = vmul.f32 %v1305_v34, %v1305_v34  ;;  %v644_v41 = vmax.f32 %v643_v39, 0.0  ;;  %v667_v18 = vld [vmem:[%s1617_s4 + $0x40] sm:$0xff]  ;;  %v673_v39 = vld [vmem:[%s1617_s4 + $0x70] sm:$0xff] }
  0x5a   : > { %v671_v33 = vld [vmem:[%s1617_s4 + $0x60] sm:$0xff] }
  0x5b   : > { %v734_v40 = vsub.f32 %v732_v37, %v733_v38  ;;  %v645_v43 = vadd.f32 1e-05, %v644_v41 }
  0x5d   : > { %v735_v42 = vmax.f32 %v734_v40, 0.0  ;;  %1065 = vrsqrt.f32 %v645_v43  ;;  %vm652_vm3 = vweird.f32 %v645_v43 }
  0x5f   : > { %v736_v44 = vadd.f32 1e-05, %v735_v42  ;;  %v674_v42 = vld [vmem:[%s1617_s4 + $0x78] sm:$0xff] }
  0x61   : > { %1067 = vrsqrt.f32 %v736_v44  ;;  %vm743_vm6 = vweird.f32 %v736_v44 }
  0x63   : > { %v1066_v45 = vpop.eup %1065 }
  0x64   : > { %v647_v47 = vmul.f32 %v1066_v45, %v645_v43  ;;  %vm653_vm4 = vweird.f32 %v1066_v45 }
  0x65   : > { %vm654_vm5 = vmor %vm652_vm3, %vm653_vm4 }
  0x66   : > { %v648_v49 = vmul.f32 %v1066_v45, %v647_v47  ;;  %v750_v47 = vld [vmem:[%s1618_s5] sm:$0xff] }
  0x67   : > { %v1068_v46 = vpop.eup %1067 }
  0x68   : > { %v738_v48 = vmul.f32 %v1068_v46, %v736_v44  ;;  %v649_v51 = vmul.f32 0.5, %v648_v49  ;;  %vm744_vm7 = vweird.f32 %v1068_v46 }
  0x69   : > { %vm1317_vm8 = vmor %vm743_vm6, %vm744_vm7 }
  0x6a   : > { %v739_v50 = vmul.f32 %v1068_v46, %v738_v48  ;;  %v650_v53 = vsub.f32 1.5, %v649_v51 }
  0x6c   : > { %v740_v52 = vmul.f32 0.5, %v739_v50  ;;  %v651_v56 = vmul.f32 %v1066_v45, %v650_v53  ;;  %v751_v50 = vld [vmem:[%s1618_s5 + $0x8] sm:$0xff]  ;;  %v752_v53 = vld [vmem:[%s1618_s5 + $0x10] sm:$0xff] }
  0x6e   : > { %v741_v54 = vsub.f32 1.5, %v740_v52  ;;  %v655_v57 = vsel %vm654_vm5, %v1066_v45, %v651_v56 }
  0x6f   : > { %v656_v60 = vmul.f32 %v655_v57, %v636_v55  ;;  %v753_v57 = vld [vmem:[%s1618_s5 + $0x18] sm:$0xff] }
  0x70   : > { %v742_v58 = vmul.f32 %v1068_v46, %v741_v54 }
  0x71   : > { %v657_v1 = vmul.f32 %v656_v60, %v639_v30  ;;  %v676_v2 = vperm.slane %v656_v60, 0  ;;  %v754_v60 = vld [vmem:[%s1618_s5 + $0x20] sm:$0xff] }
  0x72   : > { %v746_v5 = vsel %vm1317_vm8, %v1068_v46, %v742_v58 }
  0x73   : > { %v658_v6 = vsub.f32 %v1315_v59, %v657_v1  ;;  %v678_v7 = vmul.f32 %v676_v2, %v659_v62  ;;  %v679_v8 = vmul.f32 %v676_v2, %v660_v63  ;;  %v680_v9 = vmul.f32 %v676_v2, %v661_v0  ;;  %v755_v63 = vld [vmem:[%s1618_s5 + $0x28] sm:$0xff] }
  0x74   : > { %v681_v11 = vmul.f32 %v676_v2, %v662_v3  ;;  %v682_v14 = vmul.f32 %v676_v2, %v663_v4  ;;  %v747_v16 = vmul.f32 %v746_v5, %v636_v55  ;;  %v683_v17 = vmul.f32 %v676_v2, %v664_v10  ;;  %v757_v5 = vld [vmem:[%s1618_s5 + $0x38] sm:$0xff] }
  0x75   : > { %v1345_v13 = vperm.slane %v658_v6, 0  ;;  %v684_v22 = vmul.f32 %v676_v2, %v665_v12  ;;  %v685_v25 = vmul.f32 %v676_v2, %v666_v15  ;;  %v686_v28 = vmul.f32 %v676_v2, %v667_v18 }
  0x76   : > { %v748_v30 = vmul.f32 %v747_v16, %v1305_v34  ;;  %v687_v32 = vmul.f32 %v676_v2, %v668_v23  ;;  %v688_v34 = vmul.f32 %v676_v2, %v669_v26  ;;  %v689_v38 = vmul.f32 %v676_v2, %v670_v29  ;;  %v763_v23 = vld [vmem:[%s1618_s5 + $0x68] sm:$0xff]  ;;  %v764_v26 = vld [vmem:[%s1618_s5 + $0x70] sm:$0xff]  ;;  %v765_v29 = vld [vmem:[%s1618_s5 + $0x78] sm:$0xff] }
  0x77   : > { %v697_v19 = vadd.f32 %v1345_v13, %v678_v7  ;;  %v698_v20 = vadd.f32 %v1345_v13, %v679_v8  ;;  %v699_v21 = vadd.f32 %v1345_v13, %v680_v9  ;;  %v700_v24 = vadd.f32 %v1345_v13, %v681_v11  ;;  %v758_v8 = vld [vmem:[%s1618_s5 + $0x40] sm:$0xff]  ;;  %v759_v11 = vld [vmem:[%s1618_s5 + $0x48] sm:$0xff] }
  0x78   : > { %v701_v27 = vadd.f32 %v1345_v13, %v682_v14  ;;  %v702_v31 = vadd.f32 %v1345_v13, %v683_v17  ;;  %v703_v35 = vadd.f32 %v1345_v13, %v684_v22  ;;  %v704_v37 = vadd.f32 %v1345_v13, %v685_v25  ;;  %v760_v14 = vld [vmem:[%s1618_s5 + $0x50] sm:$0xff]  ;;  %v761_v17 = vld [vmem:[%s1618_s5 + $0x58] sm:$0xff] }
  0x79   : > { %713 = vst.msk [vmem:[%s1617_s4] sm:$0xff] %vm414_vm1, %v697_v19  ;;  %v705_v40 = vadd.f32 %v1345_v13, %v686_v28  ;;  %v690_v41 = vmul.f32 %v676_v2, %v671_v33  ;;  %v749_v43 = vsub.f32 %v1315_v59, %v748_v30  ;;  %v1405_v44 = vperm.slane %v747_v16, 0 }
  0x7a   : > { %714 = vst.msk [vmem:[%s1617_s4 + $0x8] sm:$0xff] %vm414_vm1, %v698_v20  ;;  %v706_v45 = vadd.f32 %v1345_v13, %v687_v32  ;;  %v691_v46 = vmul.f32 %v676_v2, %v672_v36  ;;  %v707_v48 = vadd.f32 %v1345_v13, %v688_v34  ;;  %v692_v49 = vmul.f32 %v676_v2, %v673_v39  ;;  %v762_v20 = vld [vmem:[%s1618_s5 + $0x60] sm:$0xff] }
  0x7b   : > { %715 = vst.msk [vmem:[%s1617_s4 + $0x10] sm:$0xff] %vm414_vm1, %v699_v21  ;;  %v708_v51 = vadd.f32 %v1345_v13, %v689_v38  ;;  %v693_v52 = vmul.f32 %v676_v2, %v674_v42  ;;  %v709_v54 = vadd.f32 %v1345_v13, %v690_v41  ;;  %v769_v55 = vmul.f32 %v1405_v44, %v750_v47  ;;  %v756_v2 = vld [vmem:[%s1618_s5 + $0x30] sm:$0xff] }
  0x7c   : > { %716 = vst.msk [vmem:[%s1617_s4 + $0x18] sm:$0xff] %vm414_vm1, %v700_v24  ;;  %v1437_v56 = vperm.slane %v749_v43, 0  ;;  %v710_v58 = vadd.f32 %v1345_v13, %v691_v46  ;;  %v770_v59 = vmul.f32 %v1405_v44, %v751_v50  ;;  %v711_v61 = vadd.f32 %v1345_v13, %v692_v49 }
  0x7d   : > { %717 = vst.msk [vmem:[%s1617_s4 + $0x20] sm:$0xff] %vm414_vm1, %v701_v27  ;;  %v771_v62 = vmul.f32 %v1405_v44, %v752_v53  ;;  %v712_v0 = vadd.f32 %v1345_v13, %v693_v52  ;;  %v772_v1 = vmul.f32 %v1405_v44, %v753_v57  ;;  %v773_v4 = vmul.f32 %v1405_v44, %v754_v60 }
  0x7e   : > { %718 = vst.msk [vmem:[%s1617_s4 + $0x28] sm:$0xff] %vm414_vm1, %v702_v31  ;;  %v788_v3 = vadd.f32 %v1437_v56, %v769_v55  ;;  %v789_v6 = vadd.f32 %v1437_v56, %v770_v59  ;;  %v774_v7 = vmul.f32 %v1405_v44, %v755_v63  ;;  %v775_v10 = vmul.f32 %v1405_v44, %v756_v2 }
  0x7f   : > { %719 = vst.msk [vmem:[%s1617_s4 + $0x30] sm:$0xff] %vm414_vm1, %v703_v35  ;;  %v790_v9 = vadd.f32 %v1437_v56, %v771_v62  ;;  %v791_v12 = vadd.f32 %v1437_v56, %v772_v1  ;;  %v776_v13 = vmul.f32 %v1405_v44, %v757_v5  ;;  %v792_v15 = vadd.f32 %v1437_v56, %v773_v4 }
  0x80   : > { %720 = vst.msk [vmem:[%s1617_s4 + $0x38] sm:$0xff] %vm414_vm1, %v704_v37  ;;  %v777_v16 = vmul.f32 %v1405_v44, %v758_v8  ;;  %v793_v18 = vadd.f32 %v1437_v56, %v774_v7  ;;  %v778_v19 = vmul.f32 %v1405_v44, %v759_v11  ;;  %v794_v21 = vadd.f32 %v1437_v56, %v775_v10 }
  0x81   : > { %721 = vst.msk [vmem:[%s1617_s4 + $0x40] sm:$0xff] %vm414_vm1, %v705_v40  ;;  %v779_v22 = vmul.f32 %v1405_v44, %v760_v14  ;;  %v795_v24 = vadd.f32 %v1437_v56, %v776_v13  ;;  %v780_v25 = vmul.f32 %v1405_v44, %v761_v17  ;;  %v781_v28 = vmul.f32 %v1405_v44, %v762_v20 }
  0x82   : > { %722 = vst.msk [vmem:[%s1617_s4 + $0x48] sm:$0xff] %vm414_vm1, %v706_v45  ;;  %v796_v27 = vadd.f32 %v1437_v56, %v777_v16  ;;  %v797_v30 = vadd.f32 %v1437_v56, %v778_v19  ;;  %v782_v31 = vmul.f32 %v1405_v44, %v763_v23  ;;  %v783_v33 = vmul.f32 %v1405_v44, %v764_v26 }
  0x83   : > { %723 = vst.msk [vmem:[%s1617_s4 + $0x50] sm:$0xff] %vm414_vm1, %v707_v48  ;;  %v798_v32 = vadd.f32 %v1437_v56, %v779_v22  ;;  %v799_v35 = vadd.f32 %v1437_v56, %v780_v25  ;;  %v784_v34 = vmul.f32 %v1405_v44, %v765_v29  ;;  %v800_v36 = vadd.f32 %v1437_v56, %v781_v28 }
  0x84   : > { %724 = vst.msk [vmem:[%s1617_s4 + $0x58] sm:$0xff] %vm414_vm1, %v708_v51  ;;  %v801_v37 = vadd.f32 %v1437_v56, %v782_v31  ;;  %v802_v38 = vadd.f32 %v1437_v56, %v783_v33 }
  0x85   : > { %725 = vst.msk [vmem:[%s1617_s4 + $0x60] sm:$0xff] %vm414_vm1, %v709_v54  ;;  %v803_v39 = vadd.f32 %v1437_v56, %v784_v34 }
  0x86   : > { %726 = vst.msk [vmem:[%s1617_s4 + $0x68] sm:$0xff] %vm414_vm1, %v710_v58 }
  0x87   : > { %727 = vst.msk [vmem:[%s1617_s4 + $0x70] sm:$0xff] %vm414_vm1, %v711_v61 }
  0x88   : > { %728 = vst.msk [vmem:[%s1617_s4 + $0x78] sm:$0xff] %vm414_vm1, %v712_v0 }
  0x89   : > { %804 = vst.msk [vmem:[%s1618_s5] sm:$0xff] %vm414_vm1, %v788_v3 }
  0x8a   : > { %805 = vst.msk [vmem:[%s1618_s5 + $0x8] sm:$0xff] %vm414_vm1, %v789_v6 }
  0x8b   : > { %806 = vst.msk [vmem:[%s1618_s5 + $0x10] sm:$0xff] %vm414_vm1, %v790_v9 }
  0x8c   : > { %807 = vst.msk [vmem:[%s1618_s5 + $0x18] sm:$0xff] %vm414_vm1, %v791_v12 }
  0x8d   : > { %808 = vst.msk [vmem:[%s1618_s5 + $0x20] sm:$0xff] %vm414_vm1, %v792_v15 }
  0x8e   : > { %809 = vst.msk [vmem:[%s1618_s5 + $0x28] sm:$0xff] %vm414_vm1, %v793_v18 }
  0x8f   : > { %810 = vst.msk [vmem:[%s1618_s5 + $0x30] sm:$0xff] %vm414_vm1, %v794_v21 }
  0x90   : > { %811 = vst.msk [vmem:[%s1618_s5 + $0x38] sm:$0xff] %vm414_vm1, %v795_v24 }
  0x91   : > { %812 = vst.msk [vmem:[%s1618_s5 + $0x40] sm:$0xff] %vm414_vm1, %v796_v27 }
  0x92   : > { %813 = vst.msk [vmem:[%s1618_s5 + $0x48] sm:$0xff] %vm414_vm1, %v797_v30 }
  0x93   : > { %814 = vst.msk [vmem:[%s1618_s5 + $0x50] sm:$0xff] %vm414_vm1, %v798_v32 }
  0x94   : > { %815 = vst.msk [vmem:[%s1618_s5 + $0x58] sm:$0xff] %vm414_vm1, %v799_v35 }
  0x95   : > { %816 = vst.msk [vmem:[%s1618_s5 + $0x60] sm:$0xff] %vm414_vm1, %v800_v36 }
  0x96   : > { %817 = vst.msk [vmem:[%s1618_s5 + $0x68] sm:$0xff] %vm414_vm1, %v801_v37 }
  0x97   : > { %818 = vst.msk [vmem:[%s1618_s5 + $0x70] sm:$0xff] %vm414_vm1, %v802_v38 }
  0x98   : > { %819 = vst.msk [vmem:[%s1618_s5 + $0x78] sm:$0xff] %vm414_vm1, %v803_v39 }
  0x99 PF: > { %s16_s20 = sadd.s32 1, %s1091_s20   ;;  %s1621_s18 = smov %s1087_s19 }
  0x9a   : > { %p13_p7 = scmp.ge.s32.totalorder %s16_s20, 4   ;;  %s1622_s19 = smov %s1624_s21 }
  0x9c   :  { %15 = sbr.rel (!%p13_p7) target bundleno = 2 (0x2), region = 159 }

</bundles_post_ra>
